<compile_context>
chip_gen: v7x
topology: tpu7x:2x2x1
jax: 0.10.0
libtpu: 0.0.40
codegen_flags: <defaults>
</compile_context>

<pallas_src>
import functools
import math

import jax
import jax.numpy as jnp
from jax.experimental import pallas as pl
from jax.experimental.pallas import tpu as pltpu


def _mlp_kernel(num_layers, d_in, d_out, x_ref, w_ref, b_ref, o_ref):
    """Full MLP forward for one batch tile, feature-major, entirely in VMEM.

    x_ref : (d_in, tile)   activations, batch on the lane axis
    w_ref : (L, H, H)      stacked weights; layer 0 live in [:, :d_in],
                           layer L-1 stored transposed, live in [:, :d_out]
    b_ref : (L, H, 1)      stacked biases; layer L-1 live in [:d_out, :]
    o_ref : (d_out, tile)
    """
    x = x_ref[...]                                   # (d_in, tile)

    # ---- first layer --------------------------------------------------------
    w0 = w_ref[0]                                    # (H, H)
    b0 = b_ref[0]                                    # (H, 1)
    if d_in == 1:
        # Rank-1 first layer: pure VPU broadcast FMA; the MXU would be wasted
        # on a (tile,1)x(1,H) outer product.
        h = w0[:, 0:1] * x + b0                      # (H,1)*(1,tile) -> (H,tile)
    else:
        h = jnp.dot(w0[:, :d_in], x, preferred_element_type=jnp.float32) + b0
    h = jnp.tanh(h)

    # ---- hidden layers (static unroll: small, fixed depth) ------------------
    for l in range(1, num_layers - 1):
        h = jnp.dot(w_ref[l], h, preferred_element_type=jnp.float32) + b_ref[l]
        h = jnp.tanh(h)

    # ---- last layer ----------------------------------------------------------
    wl = w_ref[num_layers - 1]                       # (H, H), live cols :d_out
    bl = b_ref[num_layers - 1][0:d_out, :]           # (d_out, 1)
    if d_out == 1:
        # Width-1 output: VPU multiply + XLU cross-sublane reduction keeps the
        # output lane-dense instead of a 1-lane-wide matmul result.
        o = jnp.sum(wl[:, 0:1] * h, axis=0, keepdims=True) + bl    # (1, tile)
    else:
        o = jax.lax.dot_general(wl[:, :d_out], h, (((0,), (0,)), ((), ())),
                                preferred_element_type=jnp.float32) + bl
    o_ref[...] = o.astype(o_ref.dtype)


def pack_params(weights, biases):
    """Pack per-layer PyTorch-layout params into two stacked, padded arrays.

    weights[i]: (d_{i+1}, d_i)   (PyTorch nn.Linear.weight layout)
    biases[i] : (d_{i+1},)

    Returns w_stack (L, H, H) and b_stack (L, H, 1), zero-padded so every layer
    slots into the same HxH tile.  First-layer weights occupy [:, :d_in]; the
    last layer is stored transposed and occupies [:, :d_out].
    """
    L = len(weights)
    assert L >= 2, "need at least input and output Linear layers"
    H = weights[0].shape[0]
    d_in = weights[0].shape[1]
    d_out = weights[-1].shape[0]
    assert d_in <= H and d_out <= H
    for i in range(1, L - 1):
        assert weights[i].shape == (H, H), "hidden layers must share width H"
    assert weights[-1].shape[1] == H

    w_stack = jnp.zeros((L, H, H), jnp.float32)
    b_stack = jnp.zeros((L, H, 1), jnp.float32)

    w_stack = w_stack.at[0, :, :d_in].set(weights[0].astype(jnp.float32))
    b_stack = b_stack.at[0, :, 0].set(biases[0].astype(jnp.float32))
    for i in range(1, L - 1):
        w_stack = w_stack.at[i].set(weights[i].astype(jnp.float32))
        b_stack = b_stack.at[i, :, 0].set(biases[i].astype(jnp.float32))
    w_stack = w_stack.at[L - 1, :, :d_out].set(weights[-1].T.astype(jnp.float32))
    b_stack = b_stack.at[L - 1, :d_out, 0].set(biases[-1].astype(jnp.float32))
    return w_stack, b_stack


def pinn_forward(x, weights, biases, *, tile_n=8192):
    """Pallas forward pass of the PINN MLP.  Matches network(inputs) exactly.

    x       : (N, d_in) float32   (any N; ragged last block handled by Pallas)
    weights : list of (d_{i+1}, d_i) float32   (PyTorch layout)
    biases  : list of (d_{i+1},)     float32
    """
    N, d_in = x.shape
    d_out = weights[-1].shape[0]
    H = weights[0].shape[0]
    L = len(weights)

    w_stack, b_stack = pack_params(weights, biases)

    # --- tile selection -------------------------------------------------------
    # One big lane-dense tile; cap at the lane-rounded batch so small PINN
    # calls run as a single grid step (grid=(1,)).  16384 cap keeps live
    # intermediates comfortably inside every generation's scoped VMEM.
    tile_cap = max(128, (min(tile_n, 16384) // 128) * 128)
    tile = max(128, min(tile_cap, pl.cdiv(N, 128) * 128))
    grid = (pl.cdiv(N, tile),)

    # Feature-major input; for d_in == 1 this transpose is a free reshape.
    x_t = jnp.transpose(x.astype(jnp.float32))       # (d_in, N)

    # --- specs ----------------------------------------------------------------
    in_specs = [
        pl.BlockSpec((d_in, tile), lambda i: (0, i)),           # x tile
        pl.BlockSpec(w_stack.shape, lambda i: (0, 0, 0)),        # all weights
        pl.BlockSpec(b_stack.shape, lambda i: (0, 0, 0)),        # all biases
    ]
    out_specs = pl.BlockSpec((d_out, tile), lambda i: (0, i))

    # --- cost estimate (kernel typically sits inside a PDE-loss graph) --------
    dims = [d_in] + [H] * (L - 1) + [d_out]
    flops = 2 * N * sum(dims[i] * dims[i + 1] for i in range(len(dims) - 1))
    transcendentals = N * sum(dims[1:-1])            # one tanh per hidden unit
    bytes_accessed = 4 * (N * (d_in + d_out) + w_stack.size + b_stack.size)

    kernel = functools.partial(_mlp_kernel, L, d_in, d_out)

    out_t = pl.pallas_call(
        kernel,
        out_shape=jax.ShapeDtypeStruct((d_out, N), jnp.float32),
        grid=grid,
        in_specs=in_specs,
        out_specs=out_specs,
        compiler_params=pltpu.CompilerParams(
            dimension_semantics=("parallel",),
            # Explicit headroom so large tiles never hit v5e's 16 MiB default
            # scoped-VMEM limit; 32 MiB is within every generation's budget.
            vmem_limit_bytes=32 * 1024 * 1024),
        cost_estimate=pl.CostEstimate(
            flops=flops,
            transcendentals=transcendentals,
            bytes_accessed=bytes_accessed),
    )(x_t, w_stack, b_stack)

    return jnp.transpose(out_t)                      # (N, d_out)


def init_params(layers, key):
    """Deterministic init matching nn.Linear's default U(-1/sqrt(fan_in), +)."""
    weights, biases = [], []
    for i in range(len(layers) - 1):
        fan_in, fan_out = layers[i], layers[i + 1]
        bound = 1.0 / math.sqrt(fan_in)
        key, kw, kb = jax.random.split(key, 3)
        w = jax.random.uniform(kw, (fan_out, fan_in), jnp.float32,
                               minval=-bound, maxval=bound)   # PyTorch (out,in)
        b = jax.random.uniform(kb, (fan_out,), jnp.float32,
                               minval=-bound, maxval=bound)
        weights.append(w)
        biases.append(b)
    return weights, biases


def reference_forward(x, weights, biases):
    """Plain-JAX reference mirroring nn.Sequential(Linear, Tanh, ..., Linear)."""
    h = x
    n = len(weights)
    for i in range(n):
        h = h @ weights[i].T + biases[i]
        if i < n - 1:
            h = jnp.tanh(h)
    return h


# TODO(synk): gravitational_solution / pde_loss / riesz_loss etc. are
# training-time loss machinery (scipy Airy functions + autograd) and are not
# part of forward(); they are intentionally not translated to Pallas.

if __name__ == "__main__":
    # GrossPitaevskiiPINN(layers=[1, 32, 32, 32, 1]): 1-D coordinate in,
    # wavefunction perturbation out.
    layers = [1, 32, 32, 32, 1]
    key = jax.random.PRNGKey(0)
    key, kx = jax.random.split(key)

    weights, biases = init_params(layers, key)

    # Primary check: N deliberately not a multiple of 128 (single ragged tile).
    N = 200
    x = jax.random.uniform(kx, (N, layers[0]), jnp.float32,
                           minval=-1.0, maxval=5.0)
    out = jax.block_until_ready(pinn_forward(x, weights, biases))
    ref = reference_forward(x, weights, biases)
    assert out.shape == (N, layers[-1])
    assert out.dtype == jnp.float32
    assert jnp.allclose(out, ref, atol=1e-5, rtol=1e-5), "mismatch vs reference"

    # Secondary check: multi-step grid with a ragged last block (masked store).
    key, kx2 = jax.random.split(key)
    N2 = 1000
    x2 = jax.random.uniform(kx2, (N2, layers[0]), jnp.float32,
                            minval=-1.0, maxval=5.0)
    out2 = jax.block_until_ready(pinn_forward(x2, weights, biases, tile_n=256))
    ref2 = reference_forward(x2, weights, biases)
    assert jnp.allclose(out2, ref2, atol=1e-5, rtol=1e-5), "multi-tile mismatch"

    print("KERNEL_OK")
</pallas_src>

<mosaic_0001>
module attributes {stable_mosaic.version = 11 : i64} {
  func.func @_mlp_kernel(%arg0: i32, %arg1: memref<1x256xf32, #tpu.memory_space<vmem>>, %arg2: memref<4x32x32xf32, #tpu.memory_space<vmem>>, %arg3: memref<4x32x1xf32, #tpu.memory_space<vmem>>, %arg4: memref<1x256xf32, #tpu.memory_space<vmem>>) attributes {dimension_semantics = [#tpu.dimension_semantics<parallel>], iteration_bounds = array<i64: 1>, scalar_prefetch = 0 : i64, scratch_operands = 0 : i64, tpu.core_type = #tpu.core_type<tc>, window_params = [{transform_indices = @transform_0, window_bounds = array<i64: 1, 256>}, {pipeline_mode = #tpu.pipeline_mode<synchronous>, transform_indices = @transform_1, window_bounds = array<i64: 4, 32, 32>}, {pipeline_mode = #tpu.pipeline_mode<synchronous>, transform_indices = @transform_2, window_bounds = array<i64: 4, 32, 1>}, {transform_indices = @transform_3, window_bounds = array<i64: 1, 256>}]} {
    %c0 = arith.constant 0 : index
    %c0_0 = arith.constant 0 : index
    %0 = vector.load %arg1[%c0, %c0_0] : memref<1x256xf32, #tpu.memory_space<vmem>>, vector<1x256xf32>
    %c0_1 = arith.constant 0 : index
    %c0_2 = arith.constant 0 : index
    %c0_3 = arith.constant 0 : index
    %1 = vector.load %arg2[%c0_1, %c0_2, %c0_3] : memref<4x32x32xf32, #tpu.memory_space<vmem>>, vector<1x32x32xf32>
    %2 = vector.shape_cast %1 : vector<1x32x32xf32> to vector<32x32xf32>
    %c0_4 = arith.constant 0 : index
    %c0_5 = arith.constant 0 : index
    %c0_6 = arith.constant 0 : index
    %3 = vector.load %arg3[%c0_4, %c0_5, %c0_6] : memref<4x32x1xf32, #tpu.memory_space<vmem>>, vector<1x32x1xf32>
    %4 = vector.shape_cast %3 : vector<1x32x1xf32> to vector<32x1xf32>
    %5 = vector.extract_strided_slice %2 {offsets = [0, 0], sizes = [32, 1], strides = [1, 1]} : vector<32x32xf32> to vector<32x1xf32>
    %6 = vector.broadcast %5 : vector<32x1xf32> to vector<32x256xf32>
    %7 = vector.broadcast %0 : vector<1x256xf32> to vector<32x256xf32>
    %8 = arith.mulf %6, %7 : vector<32x256xf32>
    %9 = vector.broadcast %4 : vector<32x1xf32> to vector<32x256xf32>
    %10 = arith.addf %8, %9 : vector<32x256xf32>
    %11 = math.tanh %10 : vector<32x256xf32>
    %c1 = arith.constant 1 : index
    %c0_7 = arith.constant 0 : index
    %c0_8 = arith.constant 0 : index
    %12 = vector.load %arg2[%c1, %c0_7, %c0_8] : memref<4x32x32xf32, #tpu.memory_space<vmem>>, vector<1x32x32xf32>
    %13 = vector.shape_cast %12 : vector<1x32x32xf32> to vector<32x32xf32>
    %cst = arith.constant dense<0.000000e+00> : vector<32x256xf32>
    %14 = tpu.matmul %13, %11, %cst {dimension_numbers = #tpu.dot_dimension_numbers<[1], [0], [0], [1], [0, 0, 1, 1], [], []>} : vector<32x32xf32>, vector<32x256xf32>, vector<32x256xf32> -> vector<32x256xf32>
    %c1_9 = arith.constant 1 : index
    %c0_10 = arith.constant 0 : index
    %c0_11 = arith.constant 0 : index
    %15 = vector.load %arg3[%c1_9, %c0_10, %c0_11] : memref<4x32x1xf32, #tpu.memory_space<vmem>>, vector<1x32x1xf32>
    %16 = vector.shape_cast %15 : vector<1x32x1xf32> to vector<32x1xf32>
    %17 = vector.broadcast %16 : vector<32x1xf32> to vector<32x256xf32>
    %18 = arith.addf %14, %17 : vector<32x256xf32>
    %19 = math.tanh %18 : vector<32x256xf32>
    %c2 = arith.constant 2 : index
    %c0_12 = arith.constant 0 : index
    %c0_13 = arith.constant 0 : index
    %20 = vector.load %arg2[%c2, %c0_12, %c0_13] : memref<4x32x32xf32, #tpu.memory_space<vmem>>, vector<1x32x32xf32>
    %21 = vector.shape_cast %20 : vector<1x32x32xf32> to vector<32x32xf32>
    %cst_14 = arith.constant dense<0.000000e+00> : vector<32x256xf32>
    %22 = tpu.matmul %21, %19, %cst_14 {dimension_numbers = #tpu.dot_dimension_numbers<[1], [0], [0], [1], [0, 0, 1, 1], [], []>} : vector<32x32xf32>, vector<32x256xf32>, vector<32x256xf32> -> vector<32x256xf32>
    %c2_15 = arith.constant 2 : index
    %c0_16 = arith.constant 0 : index
    %c0_17 = arith.constant 0 : index
    %23 = vector.load %arg3[%c2_15, %c0_16, %c0_17] : memref<4x32x1xf32, #tpu.memory_space<vmem>>, vector<1x32x1xf32>
    %24 = vector.shape_cast %23 : vector<1x32x1xf32> to vector<32x1xf32>
    %25 = vector.broadcast %24 : vector<32x1xf32> to vector<32x256xf32>
    %26 = arith.addf %22, %25 : vector<32x256xf32>
    %27 = math.tanh %26 : vector<32x256xf32>
    %c3 = arith.constant 3 : index
    %c0_18 = arith.constant 0 : index
    %c0_19 = arith.constant 0 : index
    %28 = vector.load %arg2[%c3, %c0_18, %c0_19] : memref<4x32x32xf32, #tpu.memory_space<vmem>>, vector<1x32x32xf32>
    %29 = vector.shape_cast %28 : vector<1x32x32xf32> to vector<32x32xf32>
    %c3_20 = arith.constant 3 : index
    %c0_21 = arith.constant 0 : index
    %c0_22 = arith.constant 0 : index
    %30 = vector.load %arg3[%c3_20, %c0_21, %c0_22] : memref<4x32x1xf32, #tpu.memory_space<vmem>>, vector<1x32x1xf32>
    %31 = vector.shape_cast %30 : vector<1x32x1xf32> to vector<32x1xf32>
    %32 = vector.extract_strided_slice %31 {offsets = [0, 0], sizes = [1, 1], strides = [1, 1]} : vector<32x1xf32> to vector<1x1xf32>
    %33 = vector.extract_strided_slice %29 {offsets = [0, 0], sizes = [32, 1], strides = [1, 1]} : vector<32x32xf32> to vector<32x1xf32>
    %34 = vector.broadcast %33 : vector<32x1xf32> to vector<32x256xf32>
    %35 = arith.mulf %34, %27 : vector<32x256xf32>
    %cst_23 = arith.constant dense<0.000000e+00> : vector<256xf32>
    %36 = vector.multi_reduction <add>, %35, %cst_23 [0] : vector<32x256xf32> to vector<256xf32>
    %37 = vector.shape_cast %36 : vector<256xf32> to vector<1x256xf32>
    %38 = vector.broadcast %32 : vector<1x1xf32> to vector<1x256xf32>
    %39 = arith.addf %37, %38 : vector<1x256xf32>
    %c0_24 = arith.constant 0 : index
    %c0_25 = arith.constant 0 : index
    %40 = vector.load %arg4[%c0_24, %c0_25] : memref<1x256xf32, #tpu.memory_space<vmem>>, vector<1x256xf32>
    tpu.vector_store %arg4[%c0_24, %c0_25], %39 {strides = array<i32>} : memref<1x256xf32, #tpu.memory_space<vmem>>, vector<1x256xf32>,
    return
  }
  func.func @transform_0(%arg0: i32) -> (i32, i32) {
    %c0_i32 = arith.constant 0 : i32
    %c0_i32_0 = arith.constant 0 : i32
    return %c0_i32, %arg0 : i32, i32
  }
  func.func @transform_1(%arg0: i32) -> (i32, i32, i32) {
    %c0_i32 = arith.constant 0 : i32
    %c0_i32_0 = arith.constant 0 : i32
    %c0_i32_1 = arith.constant 0 : i32
    %c0_i32_2 = arith.constant 0 : i32
    return %c0_i32, %c0_i32_0, %c0_i32_1 : i32, i32, i32
  }
  func.func @transform_2(%arg0: i32) -> (i32, i32, i32) {
    %c0_i32 = arith.constant 0 : i32
    %c0_i32_0 = arith.constant 0 : i32
    %c0_i32_1 = arith.constant 0 : i32
    %c0_i32_2 = arith.constant 0 : i32
    return %c0_i32, %c0_i32_0, %c0_i32_1 : i32, i32, i32
  }
  func.func @transform_3(%arg0: i32) -> (i32, i32) {
    %c0_i32 = arith.constant 0 : i32
    %c0_i32_0 = arith.constant 0 : i32
    return %c0_i32, %arg0 : i32, i32
  }
}

</mosaic_0001>

<bundles_post_ra>
// kernel: tpu_custom_call.1
= control target key start
LH: loop header
LB: loop body
LE: loop exit
PB: predicated region body
PF: predicated region fallthrough
CT: control target
= control target key end

     0   :  { %v598_v2 = vmov 0   ;;  %s747_s0 = inlined_call_operand.vmem [shape: f32[1,200], index: 0, kind: input, shape index: {}]   ;;  %s748_s1 = inlined_call_operand.vmem [shape: f32[4,32,32], index: 1, kind: input, shape index: {}]   ;;  %s749_s2 = inlined_call_operand.vmem [shape: f32[4,32,1], index: 2, kind: input, shape index: {}]   ;;  %s750_s3 = inlined_call_operand.hbm [shape: f32[1,200], index: 3, kind: output, shape index: {}]  }
   0x1   :  { %v20_v0 = vld [vmem:[%s749_s2] sm:$0xff]  ;;  %525 = vset.pattern.permute.xlu1 %v598_v2  ;;  %524 = vset.pattern.permute.xlu0 %v598_v2  ;;  %v21_v3 = vld [vmem:[%s749_s2 + $0x8] sm:$0xff]  ;;  %v19_v5 = vld [vmem:[%s748_s1 + $0x18] sm:$0xff] }
   0x2   :  { %v16_v1 = vld [vmem:[%s748_s1] sm:$0xff]  ;;  %65 = vperm.xlu1 %525, %v20_v0   ;;  %v17_v4 = vld [vmem:[%s748_s1 + $0x8] sm:$0xff]  ;;  %v18_v6 = vld [vmem:[%s748_s1 + $0x10] sm:$0xff] }
   0x3   :  { %26 = vperm.xlu0 %524, %v16_v1  }
   0x6   :  { %70 = vperm.xlu1 %525, %v21_v3  }
   0x7   :  { %31 = vperm.xlu0 %524, %v17_v4  }
   0x8   :  { %8 = vsyncpa [#allocation3], 0  ;;  %v23_v7 = vld [vmem:[%s749_s2 + $0x18] sm:$0xff]  ;;  %v22_v8 = vld [vmem:[%s749_s2 + $0x10] sm:$0xff]  ;;  %v599_v21 = vmov 0.0   ;;  %v45_v23 = vlaneseq  ;;  %vm129_vm0 = vcmask 261120  }
   0x9   :  { %v480_v9 = vld [vmem:[%s749_s2 + $0x28] sm:$0xff]  ;;  %v479_v10 = vld [vmem:[%s749_s2 + $0x20] sm:$0xff]  ;;  %v482_v11 = vld [vmem:[%s749_s2 + $0x38] sm:$0xff]  ;;  %206 = vmatprep.mubr.f32.mxu0 %v599_v21  ;;  %345 = vmatprep.mubr.f32.mxu1 %v599_v21 }
   0xa   :  { %41 = vperm.xlu1 %525, %v19_v5   ;;  %v481_v12 = vld [vmem:[%s749_s2 + $0x30] sm:$0xff]  ;;  %v492_v13 = vld [vmem:[%s749_s2 + $0x48] sm:$0xff]  ;;  %v491_v14 = vld [vmem:[%s749_s2 + $0x40] sm:$0xff]  ;;  %v688_v24 = vshrl.u32 %v45_v23, 7  ;;  %vm458_vm1 = vcmp.lt.s32.totalorder %v45_v23, 256 }
   0xb   :  { %36 = vperm.xlu0 %524, %v18_v6   ;;  %v494_v15 = vld [vmem:[%s749_s2 + $0x58] sm:$0xff]  ;;  %v493_v16 = vld [vmem:[%s749_s2 + $0x50] sm:$0xff]  ;;  %v500_v17 = vld [vmem:[%s748_s1 + $0x68] sm:$0xff] }
   0xc   :  { %v499_v18 = vld [vmem:[%s748_s1 + $0x60] sm:$0xff]  ;;  %v502_v19 = vld [vmem:[%s748_s1 + $0x78] sm:$0xff]  ;;  %v501_v20 = vld [vmem:[%s748_s1 + $0x70] sm:$0xff]  ;;  %v47_v25 = vsub.s32 0, %v688_v24  ;;  %v51_v26 = vsub.s32 1, %v688_v24 }
   0xd   :  { %v503_v22 = vld [vmem:[%s749_s2 + $0x60] sm:$0xff]  ;;  %v476_v3 = vld [vmem:[%s748_s1 + $0x28] sm:$0xff]  ;;  %v477_v4 = vld [vmem:[%s748_s1 + $0x30] sm:$0xff] }
   0xe   :  { %80 = vperm.xlu1 %525, %v23_v7   ;;  %v15_v27 = vld [vmem:[%s747_s0] sm:$0x3]  ;;  %v478_v5 = vld [vmem:[%s748_s1 + $0x38] sm:$0xff] }
   0xf   :  { %75 = vperm.xlu0 %524, %v22_v8   ;;  %v48_v28 = vrot.slane %v15_v27, %v47_v25  ;;  %v52_v29 = vrot.slane %v15_v27, %v51_v26  ;;  %v475_v2 = vld [vmem:[%s748_s1 + $0x20] sm:$0xff] }
  0x12   :  { %116 = vperm.xlu1 %525, %v480_v9  }
  0x13   :  { %111 = vperm.xlu0 %524, %v479_v10  }
  0x16   :  { %126 = vperm.xlu1 %525, %v482_v11  }
  0x17   :  { %121 = vperm.xlu0 %524, %v481_v12  }
  0x1a   :  { %256 = vperm.xlu1 %525, %v492_v13  }
  0x1b   :  { %251 = vperm.xlu0 %524, %v491_v14  }
  0x1e   :  { %266 = vperm.xlu1 %525, %v494_v15  }
  0x1f   :  { %261 = vperm.xlu0 %524, %v493_v16  }
  0x22   :  { %392 = vperm.xlu1 %525, %v500_v17  }
  0x23   :  { %387 = vperm.xlu0 %524, %v499_v18  }
  0x26   :  { %402 = vperm.xlu1 %525, %v502_v19  }
  0x27   :  { %397 = vperm.xlu0 %524, %v501_v20  }
  0x2b   :  { %433 = vperm.xlu0 %524, %v503_v22  }
  0x81   :  { %v66_v30 = vpop.permute.xlu1 %65 }
  0x82   :  { %v27_v31 = vpop.permute.xlu0 %26 }
  0x83   :  { %v55_v32 = vmul.f32 %v48_v28, %v27_v31  ;;  %v56_v33 = vmul.f32 %v52_v29, %v27_v31 }
  0x85   :  { %v83_v34 = vadd.f32 %v66_v30, %v55_v32  ;;  %v84_v35 = vadd.f32 %v66_v30, %v56_v33  ;;  %v71_v36 = vpop.permute.xlu1 %70 }
  0x86   :  { %v32_v37 = vpop.permute.xlu0 %31 }
  0x87   :  { %v57_v38 = vmul.f32 %v48_v28, %v32_v37  ;;  %v58_v39 = vmul.f32 %v52_v29, %v32_v37  ;;  %526 = vtanh.f32 %v83_v34 }
  0x88   :  { %528 = vtanh.f32 %v84_v35 }
  0x89   :  { %v85_v40 = vadd.f32 %v71_v36, %v57_v38  ;;  %v86_v41 = vadd.f32 %v71_v36, %v58_v39  ;;  %v42_v42 = vpop.permute.xlu1 %41 }
  0x8a   :  { %v37_v43 = vpop.permute.xlu0 %36  ;;  %v61_v44 = vmul.f32 %v48_v28, %v42_v42  ;;  %v62_v45 = vmul.f32 %v52_v29, %v42_v42  ;;  %v488_v42 = vld [vmem:[%s748_s1 + $0x48] sm:$0xff] }
  0x8b   :  { %530 = vtanh.f32 %v85_v40  ;;  %v59_v46 = vmul.f32 %v48_v28, %v37_v43  ;;  %v60_v47 = vmul.f32 %v52_v29, %v37_v43  ;;  %v489_v43 = vld [vmem:[%s748_s1 + $0x50] sm:$0xff] }
  0x8c   :  { %532 = vtanh.f32 %v86_v41  ;;  %v487_v41 = vld [vmem:[%s748_s1 + $0x40] sm:$0xff] }
  0x8d   :  { %v81_v48 = vpop.permute.xlu1 %80 }
  0x8e   :  { %v76_v49 = vpop.permute.xlu0 %75  ;;  %v89_v50 = vadd.f32 %v81_v48, %v61_v44  ;;  %v90_v51 = vadd.f32 %v81_v48, %v62_v45  ;;  %v490_v44 = vld [vmem:[%s748_s1 + $0x58] sm:$0xff]  ;;  %s601_s1 = smov [#allocation2]  }
  0x8f   :  { %v87_v52 = vadd.f32 %v76_v49, %v59_v46  ;;  %v88_v53 = vadd.f32 %v76_v49, %v60_v47  ;;  %s467_s16 = sshll.u32 %s601_s1, 4  ;;  %s468_s16 = int_to_ptr.vmem [resolvable:$true] %s467_s16 }
  0x90   :  { %534 = vtanh.f32 %v89_v50  ;;  %s574_s17 = scalar_lea.vmem %s468_s16, 32  ;;  %p579_p1 = scmp.lt.s32.totalorder %s468_s16, %s468_s16 }
  0x91   :  { %536 = vtanh.f32 %v90_v51  ;;  %v527_v54 = vpop.eup %526  ;;  %v117_v11 = vpop.permute.xlu1 %116  ;;  %p575_p0 = scmp.ne.s32.totalorder %s468_s16, %s574_s17  ;;  %p580_p2 = scmp.lt.s32.totalorder %s574_s17, %s574_s17 }
  0x92   :  { %538 = vtanh.f32 %v87_v52  ;;  %v529_v55 = vpop.eup %528  ;;  %v112_v6 = vpop.permute.xlu0 %111 }
  0x93   :  { %540 = vtanh.f32 %v88_v53  ;;  %p581_p3 = por %p580_p2, %p579_p1 }
  0x95   :  { %v531_v56 = vpop.eup %530  ;;  %v127_v22 = vpop.permute.xlu1 %126  ;;  %p582_p4 = pnand %p581_p3, %p575_p0 }
  0x96   :  { %v533_v57 = vpop.eup %532  ;;  %v506_v58 = vpack.c.bf16 %v531_v56, %v527_v54  ;;  %v122_v16 = vpop.permute.xlu0 %121 }
  0x97   :  { %v504_v59 = vpack.c.bf16 %v533_v57, %v529_v55 }
  0x99   :  { %505 = vmatprep.subr.bf16.mxu0 %v504_v59  ;;  %v257_v50 = vpop.permute.xlu1 %256 }
  0x9a   :  { %507 = vmatpush1.bf16.msra.mxu0 %v506_v58  ;;  %v535_v60 = vpop.eup %534  ;;  %v252_v45 = vpop.permute.xlu0 %251 }
  0x9b   :  { %v537_v61 = vpop.eup %536 }
  0x9c   :  { %v539_v62 = vpop.eup %538 }
  0x9d   :  { %v541_v63 = vpop.eup %540  ;;  %v510_v0 = vpack.c.bf16 %v535_v60, %v539_v62  ;;  %v267_v59 = vpop.permute.xlu1 %266 }
  0x9e   :  { %v508_v1 = vpack.c.bf16 %v537_v61, %v541_v63 }
  0xa0   :  { %509 = vmatprep.subr.bf16.mxu0 %v508_v1 }
  0xa1   :  { %511 = vmatpush1.bf16.msra.mxu0 %v510_v0 }
  0xa4   :  { %483 = vmatmul.mubr.msk.f32.vlgmr.msra.gmra.mrb[0].mxu0 %vm129_vm0, %v475_v2 }
  0xa5   :  { %212 = vmatprep.mubr.f32.mxu0 %v599_v21 }
  0xa8   :  { %484 = vmatmul.mubr.msk.f32.gmra.mrb[2].mxu0 %vm129_vm0, %v476_v3 }
  0xa9   :  { %218 = vmatprep.mubr.f32.mxu0 %v599_v21 }
  0xac   :  { %485 = vmatmul.mubr.msk.f32.gmra.mrb[4].mxu0 %vm129_vm0, %v477_v4  ;;  %v393_v4 = vpop.permute.xlu1 %392 }
  0xad   :  { %224 = vmatprep.mubr.f32.mxu0 %v599_v21 }
  0xb0   :  { %486 = vmatmul.mubr.msk.f32.gmra.mrb[6].mxu0 %vm129_vm0, %v478_v5 }
 0x177   :  { %v208_v7 = vpop.f32.mrb[0].mxu0 }
 0x178   :  { %v209_v8 = vadd.f32 %v208_v7, %v112_v6  ;;  %v210_v9 = vpop.f32.mrb[1].mxu0 }
 0x179   :  { %v211_v10 = vadd.f32 %v210_v9, %v112_v6 }
 0x17a   :  { %542 = vtanh.f32 %v209_v8 }
 0x17b   :  { %v214_v12 = vpop.f32.mrb[2].mxu0  ;;  %544 = vtanh.f32 %v211_v10 }
 0x17c   :  { %v215_v13 = vadd.f32 %v214_v12, %v117_v11  ;;  %v216_v14 = vpop.f32.mrb[3].mxu0 }
 0x17d   :  { %v217_v15 = vadd.f32 %v216_v14, %v117_v11 }
 0x17e   :  { %546 = vtanh.f32 %v215_v13 }
 0x17f   :  { %548 = vtanh.f32 %v217_v15  ;;  %v220_v17 = vpop.f32.mrb[4].mxu0 }
 0x180   :  { %v221_v18 = vadd.f32 %v220_v17, %v122_v16  ;;  %v222_v19 = vpop.f32.mrb[5].mxu0 }
 0x181   :  { %v223_v20 = vadd.f32 %v222_v19, %v122_v16  ;;  %v403_v19 = vpop.permute.xlu1 %402 }
 0x182   :  { %550 = vtanh.f32 %v221_v18 }
 0x183   :  { %v226_v25 = vpop.f32.mrb[6].mxu0  ;;  %552 = vtanh.f32 %v223_v20 }
 0x184   :  { %v227_v26 = vadd.f32 %v226_v25, %v127_v22  ;;  %v228_v27 = vpop.f32.mrb[7].mxu0  ;;  %v543_v29 = vpop.eup %542 }
 0x185   :  { %v229_v28 = vadd.f32 %v228_v27, %v127_v22  ;;  %v545_v30 = vpop.eup %544 }
 0x186   :  { %554 = vtanh.f32 %v227_v26 }
 0x187   :  { %556 = vtanh.f32 %v229_v28 }
 0x188   :  { %v547_v31 = vpop.eup %546 }
 0x189   :  { %v549_v32 = vpop.eup %548  ;;  %v514_v33 = vpack.c.bf16 %v547_v31, %v543_v29 }
 0x18a   :  { %v512_v34 = vpack.c.bf16 %v549_v32, %v545_v30 }
 0x18c   :  { %513 = vmatprep.subr.bf16.mxu1 %v512_v34  ;;  %v551_v35 = vpop.eup %550 }
 0x18d   :  { %515 = vmatpush1.bf16.msra.mxu1 %v514_v33  ;;  %v553_v36 = vpop.eup %552 }
 0x190   :  { %v555_v37 = vpop.eup %554 }
 0x191   :  { %v557_v38 = vpop.eup %556  ;;  %v518_v39 = vpack.c.bf16 %v555_v37, %v551_v35  ;;  %v600_v35 = vmov 1966171168  }
 0x192   :  { %v516_v40 = vpack.c.bf16 %v557_v38, %v553_v36  ;;  %v442_v36 = vunpack.c.l.s4 %v600_v35 }
 0x194   :  { %517 = vmatprep.subr.bf16.mxu1 %v516_v40 }
 0x195   :  { %519 = vmatpush1.bf16.msra.mxu1 %v518_v39 }
 0x198   :  { %495 = vmatmul.mubr.msk.f32.vlgmr.msra.gmra.mrb[0].mxu1 %vm129_vm0, %v487_v41  ;;  %v443_v41 = vunpack.c.0.s8 %v442_v36 }
 0x199   :  { %351 = vmatprep.mubr.f32.mxu1 %v599_v21 }
 0x19c   :  { %496 = vmatmul.mubr.msk.f32.gmra.mrb[2].mxu1 %vm129_vm0, %v488_v42 }
 0x19d   :  { %357 = vmatprep.mubr.f32.mxu1 %v599_v21 }
 0x1a0   :  { %497 = vmatmul.mubr.msk.f32.gmra.mrb[4].mxu1 %vm129_vm0, %v489_v43 }
 0x1a1   :  { %363 = vmatprep.mubr.f32.mxu1 %v599_v21  ;;  %v262_v21 = vpop.permute.xlu0 %261 }
 0x1a4   :  { %498 = vmatmul.mubr.msk.f32.gmra.mrb[6].mxu1 %vm129_vm0, %v490_v44 }
 0x1a5   :  { %v388_v1 = vpop.permute.xlu0 %387 }
 0x1a9   :  { %v398_v12 = vpop.permute.xlu0 %397 }
 0x1ad   :  { %v434_v43 = vpop.permute.xlu0 %433 }
 0x26b   :  { %v347_v46 = vpop.f32.mrb[0].mxu1 }
 0x26c   :  { %v348_v47 = vadd.f32 %v347_v46, %v252_v45  ;;  %v349_v48 = vpop.f32.mrb[1].mxu1 }
 0x26d   :  { %v350_v49 = vadd.f32 %v349_v48, %v252_v45 }
 0x26e   :  { %558 = vtanh.f32 %v348_v47  ;;  %v446_v47 = vsub.s32 %v443_v41, %v688_v24 }
 0x26f   :  { %v353_v51 = vpop.f32.mrb[2].mxu1  ;;  %560 = vtanh.f32 %v350_v49 }
 0x270   :  { %v354_v52 = vadd.f32 %v353_v51, %v257_v50  ;;  %v355_v53 = vpop.f32.mrb[3].mxu1 }
 0x271   :  { %v356_v54 = vadd.f32 %v355_v53, %v257_v50 }
 0x272   :  { %562 = vtanh.f32 %v354_v52 }
 0x273   :  { %564 = vtanh.f32 %v356_v54  ;;  %v359_v55 = vpop.f32.mrb[4].mxu1 }
 0x274   :  { %v360_v56 = vadd.f32 %v359_v55, %v262_v21  ;;  %v361_v57 = vpop.f32.mrb[5].mxu1 }
 0x275   :  { %v362_v58 = vadd.f32 %v361_v57, %v262_v21 }
 0x276   :  { %566 = vtanh.f32 %v360_v56 }
 0x277   :  { %568 = vtanh.f32 %v362_v58  ;;  %v365_v60 = vpop.f32.mrb[6].mxu1 }
 0x278   :  { %v366_v61 = vadd.f32 %v365_v60, %v267_v59  ;;  %v367_v62 = vpop.f32.mrb[7].mxu1  ;;  %v559_v0 = vpop.eup %558 }
 0x279   :  { %v368_v63 = vadd.f32 %v367_v62, %v267_v59  ;;  %v561_v2 = vpop.eup %560  ;;  %v405_v6 = vmul.f32 %v559_v0, %v388_v1 }
 0x27a   :  { %570 = vtanh.f32 %v366_v61  ;;  %v406_v8 = vmul.f32 %v561_v2, %v388_v1 }
 0x27b   :  { %572 = vtanh.f32 %v368_v63 }
 0x27c   :  { %v563_v3 = vpop.eup %562 }
 0x27d   :  { %v565_v5 = vpop.eup %564  ;;  %v407_v7 = vmul.f32 %v563_v3, %v393_v4 }
 0x27e   :  { %v408_v9 = vmul.f32 %v565_v5, %v393_v4 }
 0x27f   :  { %v413_v10 = vadd.f32 %v407_v7, %v405_v6 }
 0x280   :  { %v567_v11 = vpop.eup %566  ;;  %v422_v13 = vadd.f32 %v408_v9, %v406_v8 }
 0x281   :  { %v569_v14 = vpop.eup %568  ;;  %v409_v15 = vmul.f32 %v567_v11, %v398_v12 }
 0x282   :  { %v410_v16 = vmul.f32 %v569_v14, %v398_v12 }
 0x283   :  { %v414_v17 = vadd.f32 %v413_v10, %v409_v15 }
 0x284   :  { %v571_v18 = vpop.eup %570  ;;  %v423_v20 = vadd.f32 %v422_v13, %v410_v16 }
 0x285   :  { %v573_v22 = vpop.eup %572  ;;  %v411_v25 = vmul.f32 %v571_v18, %v403_v19 }
 0x286   :  { %v412_v26 = vmul.f32 %v573_v22, %v403_v19 }
 0x287   :  { %v415_v27 = vadd.f32 %v414_v17, %v411_v25 }
 0x288   :  { %v424_v28 = vadd.f32 %v423_v20, %v412_v26 }
 0x289   :  { %v416_v29 = vrot.slane %v415_v27, 4 }
 0x28a   :  { %v425_v30 = vrot.slane %v424_v28, 4 }
 0x28b   :  { %v417_v31 = vadd.f32 %v416_v29, %v415_v27 }
 0x28c   :  { %v426_v32 = vadd.f32 %v425_v30, %v424_v28 }
 0x28d   :  { %v418_v33 = vrot.slane %v417_v31, 2 }
 0x28e   :  { %v427_v34 = vrot.slane %v426_v32, 2 }
 0x28f   :  { %v419_v37 = vadd.f32 %v418_v33, %v417_v31 }
 0x290   :  { %v428_v38 = vadd.f32 %v427_v34, %v426_v32 }
 0x291   :  { %v420_v39 = vrot.slane %v419_v37, 1 }
 0x292   :  { %v429_v40 = vrot.slane %v428_v38, 1 }
 0x293   :  { %v421_v42 = vadd.f32 %v420_v39, %v419_v37 }
 0x294   :  { %v430_v44 = vadd.f32 %v429_v40, %v428_v38 }
 0x295   :  { %v436_v45 = vadd.f32 %v434_v43, %v421_v42 }
 0x296   :  { %v437_v46 = vadd.f32 %v434_v43, %v430_v44 }
 0x298   :  { %v440_v48 = vcombine.low %v436_v45, %v437_v46 }
 0x29a   :  { %v447_v49 = vrot.slane %v440_v48, %v446_v47 }
 0x29c   :  { %v454_v50 = vrot.slane %v447_v49, %v446_v47 }
 0x29e   :  { %460 = vst.msk [vmem:[#allocation2] sm:$0x3] %vm458_vm1, %v454_v50 }
 0x29f   :  { %585 = shalt.err (!%p582_p4)
}
 0x2a0   :  { %s586_s20 = scalar_lea.hbm %s750_s3, 32 }
 0x2a1   :  { %p587_p5 = scmp.ne.s32.totalorder %s750_s3, %s586_s20  ;;  %p590_p6 = scmp.lt.u32.totalorder %s586_s20, %s750_s3 }
 0x2a3   :  { %p592_p7 = pnand %p590_p6, %p587_p5 }
 0x2a5   :  { %595 = shalt.err (!%p592_p7)
}
 0x2a6   :  { %470 = dma.vmem_to_hbm [thread:$0]  %s468_s16, 32, %s750_s3, [#allocation3]  }
 0x2a7   :  { %596 = dma.done.wait [#allocation3], 32  }
 0x2a8   :  { %597 = vsyncadd [#allocation3], 4294967264 }
 0x2a9   :  { %474 = vsyncpa [#allocation3], 1 }

</bundles_post_ra>
